<compile_context>
chip_gen: v5e
topology: v5e:2x2
jax: 0.10.0
libtpu: 0.0.40
codegen_flags: <defaults>
</compile_context>

<pallas_src>
import functools

import jax
import jax.numpy as jnp
import numpy as np
from jax.experimental import pallas as pl
from jax.experimental.pallas import tpu as pltpu


# -----------------------------------------------------------------------------
# Fused Pallas forward for ConvBlock
# -----------------------------------------------------------------------------
def conv_block_forward(x_nchw, params, *, do_maxpool=False, eps=1e-5):
    """Returns (out_nchw, metrics) mirroring ConvBlock.forward with perturb=None."""
    w_oihw, _bias, gamma, beta = params  # conv bias cancels under train-mode BN
    N, Cin, H, W = x_nchw.shape
    Cout, _, KH, KW = w_oihw.shape
    HW = H * W
    NHW = N * HW
    KKC = KH * KW * Cin
    Hp, Wp = H // 2, W // 2
    HWp = Hp * Wp
    NHWp = N * HWp
    inv_cnt = 1.0 / float(NHW)
    out_lanes = NHWp if do_maxpool else NHW

    # --- wrapper glue: im2col + weight flatten (pure layout, no conv math) ----
    xf = x_nchw.astype(jnp.float32)
    x_pad = jnp.pad(xf, ((0, 0), (0, 0), (1, 1), (1, 1)))          # (N,Cin,H+2,W+2)
    taps = [x_pad[:, :, dy:dy + H, dx:dx + W]                      # tap order (dy,dx)
            for dy in range(KH) for dx in range(KW)]
    x_cols = (jnp.stack(taps, axis=0)                              # (9, N, Cin, H, W)
              .transpose(0, 2, 1, 3, 4)                            # (9, Cin, N, H, W)
              .reshape(KKC, NHW)                                   # lane = n*HW + h*W + w
              .astype(jnp.bfloat16))                               # MXU operand -> bf16
    w_flat = (jnp.transpose(w_oihw, (0, 2, 3, 1))
              .reshape(Cout, KKC).astype(jnp.bfloat16))            # MXU operand -> bf16
    gamma2 = gamma.reshape(Cout, 1).astype(jnp.float32)
    beta2 = beta.reshape(Cout, 1).astype(jnp.float32)

    # --- single fused kernel, single grid step --------------------------------
    def kernel(xc_ref, w_ref, g_ref, b_ref, o_ref):
        # Conv as one lane-dense MXU matmul: (Cout,KKC)@(KKC,N*HW), f32 accum.
        # Conv bias intentionally omitted (exactly cancelled by batch-stat BN).
        acc = jnp.dot(w_ref[...], xc_ref[...],
                      preferred_element_type=jnp.float32)          # (Cout, N*HW) f32

        # Train-mode batch stats over the whole (batch*spatial) lane axis.
        mean = jnp.sum(acc, axis=1, keepdims=True) * inv_cnt
        var = jnp.sum(acc * acc, axis=1, keepdims=True) * inv_cnt - mean * mean
        var = jnp.maximum(var, 0.0)           # guard E[x^2]-E[x]^2 cancellation
        sc = g_ref[...] * jax.lax.rsqrt(var + eps)
        sh = b_ref[...] - mean * sc

        y = jnp.maximum(acc * sc + sh, 0.0)   # BN + ReLU, f32 on the VPU

        if do_maxpool:
            # Bring right / below / below-right neighbours onto each 2x2
            # window's top-left lane (XLU rolls + VPU max).  Wrap-around lanes
            # never land on selected (even-row, even-col) positions.
            ym = jnp.maximum(y, pltpu.roll(y, NHW - 1, 1))     # +1 neighbour
            ym = jnp.maximum(ym, pltpu.roll(ym, NHW - W, 1))   # +W / +W+1
            # One-hot gather of the top-left lanes with a single selector
            # matmul; selector built on-device so it never touches HBM.
            row = jax.lax.broadcasted_iota(jnp.int32, (NHW, NHWp), 0)
            col = jax.lax.broadcasted_iota(jnp.int32, (NHW, NHWp), 1)
            n = col // HWp
            rem = col - n * HWp
            r = rem // Wp
            c = rem - r * Wp
            src = n * HW + (2 * r) * W + 2 * c
            sel = (row == src).astype(jnp.bfloat16)            # 0/1 exact in bf16
            y = jnp.dot(ym.astype(jnp.bfloat16), sel,
                        preferred_element_type=jnp.float32)    # (Cout, N*HWp)

        o_ref[...] = y.astype(o_ref.dtype)                     # lane-dense store

    out_flat = pl.pallas_call(
        kernel,
        out_shape=jax.ShapeDtypeStruct((Cout, out_lanes), jnp.float32),
        grid=(1,),
        in_specs=[
            pl.BlockSpec((KKC, NHW), lambda i: (0, 0)),    # im2col, bf16
            pl.BlockSpec((Cout, KKC), lambda i: (0, 0)),   # weights, bf16
            pl.BlockSpec((Cout, 1), lambda i: (0, 0)),     # gamma
            pl.BlockSpec((Cout, 1), lambda i: (0, 0)),     # beta
        ],
        out_specs=pl.BlockSpec((Cout, out_lanes), lambda i: (0, 0)),
        compiler_params=pltpu.CompilerParams(
            dimension_semantics=("arbitrary",),
        ),
    )(x_cols, w_flat, gamma2, beta2)

    # Wrapper-side layout plumbing back to NCHW.
    if do_maxpool:
        out_nchw = out_flat.reshape(Cout, N, Hp, Wp).transpose(1, 0, 2, 3)
    else:
        out_nchw = out_flat.reshape(Cout, N, H, W).transpose(1, 0, 2, 3)
    metrics = None  # perturb is None in this synthetic setup
    return out_nchw, metrics


# -----------------------------------------------------------------------------
# Pure-JAX reference (same math, XLA ops) for a correctness smoke test
# -----------------------------------------------------------------------------
def reference_forward(x_nchw, params, *, do_maxpool=False, eps=1e-5):
    w_oihw, bias, gamma, beta = params
    out = jax.lax.conv_general_dilated(
        x_nchw.astype(jnp.float32), w_oihw.astype(jnp.float32),
        window_strides=(1, 1), padding=((1, 1), (1, 1)),
        dimension_numbers=("NCHW", "OIHW", "NCHW"))
    out = out + bias[None, :, None, None]
    mean = out.mean(axis=(0, 2, 3), keepdims=True)
    var = out.var(axis=(0, 2, 3), keepdims=True)          # biased
    y = (out - mean) * jax.lax.rsqrt(var + eps)
    y = gamma[None, :, None, None] * y + beta[None, :, None, None]
    y = jnp.maximum(y, 0.0)
    if do_maxpool:
        y = jax.lax.reduce_window(y, -jnp.inf, jax.lax.max,
                                  (1, 1, 2, 2), (1, 1, 2, 2), "VALID")
    return y


if __name__ == "__main__":
    # ConvBlock(in_channels=4, out_channels=8, perturb=None)
    N, Cin, Cout, H, W, K = 2, 4, 8, 16, 16, 3

    key = jax.random.PRNGKey(0)
    kx, kw, kb, kg, kbt = jax.random.split(key, 5)

    x = jax.random.normal(kx, (N, Cin, H, W), dtype=jnp.float32)

    fan_in = Cin * K * K
    lim = 1.0 / np.sqrt(fan_in)
    w = jax.random.uniform(kw, (Cout, Cin, K, K), jnp.float32, -lim, lim)
    b = jax.random.uniform(kb, (Cout,), jnp.float32, -lim, lim)
    gamma = jax.random.uniform(kg, (Cout,), jnp.float32, 0.5, 1.5)
    beta = 0.1 * jax.random.normal(kbt, (Cout,), dtype=jnp.float32)
    params = (w, b, gamma, beta)

    for do_maxpool in (False, True):
        fwd = jax.jit(functools.partial(conv_block_forward, do_maxpool=do_maxpool))
        out, metrics = fwd(x, params)
        out = jax.block_until_ready(out)
        ref = jax.block_until_ready(
            reference_forward(x, params, do_maxpool=do_maxpool))
        exp_shape = (N, Cout, H // 2, W // 2) if do_maxpool else (N, Cout, H, W)
        assert out.shape == exp_shape, (out.shape, exp_shape)
        assert metrics is None
        np.testing.assert_allclose(np.asarray(out), np.asarray(ref),
                                   rtol=2e-2, atol=2e-2)

    print("KERNEL_OK")
</pallas_src>

<mosaic_0001>
module attributes {stable_mosaic.version = 11 : i64} {
  func.func @kernel(%arg0: i32, %arg1: memref<36x512xbf16, #tpu.memory_space<vmem>>, %arg2: memref<8x36xbf16, #tpu.memory_space<vmem>>, %arg3: memref<8x1xf32, #tpu.memory_space<vmem>>, %arg4: memref<8x1xf32, #tpu.memory_space<vmem>>, %arg5: memref<8x512xf32, #tpu.memory_space<vmem>>) attributes {dimension_semantics = [#tpu.dimension_semantics<arbitrary>], iteration_bounds = array<i64: 1>, scalar_prefetch = 0 : i64, scratch_operands = 0 : i64, tpu.core_type = #tpu.core_type<tc>, window_params = [{pipeline_mode = #tpu.pipeline_mode<synchronous>, transform_indices = @transform_0, window_bounds = array<i64: 36, 512>}, {pipeline_mode = #tpu.pipeline_mode<synchronous>, transform_indices = @transform_1, window_bounds = array<i64: 8, 36>}, {pipeline_mode = #tpu.pipeline_mode<synchronous>, transform_indices = @transform_2, window_bounds = array<i64: 8, 1>}, {pipeline_mode = #tpu.pipeline_mode<synchronous>, transform_indices = @transform_3, window_bounds = array<i64: 8, 1>}, {pipeline_mode = #tpu.pipeline_mode<synchronous>, transform_indices = @transform_4, window_bounds = array<i64: 8, 512>}]} {
    %c0 = arith.constant 0 : index
    %c0_0 = arith.constant 0 : index
    %0 = vector.load %arg2[%c0, %c0_0] : memref<8x36xbf16, #tpu.memory_space<vmem>>, vector<8x36xbf16>
    %c0_1 = arith.constant 0 : index
    %c0_2 = arith.constant 0 : index
    %1 = vector.load %arg1[%c0_1, %c0_2] : memref<36x512xbf16, #tpu.memory_space<vmem>>, vector<36x512xbf16>
    %cst = arith.constant dense<0.000000e+00> : vector<8x512xf32>
    %2 = tpu.matmul %0, %1, %cst {dimension_numbers = #tpu.dot_dimension_numbers<[1], [0], [0], [1], [0, 0, 1, 1], [], []>} : vector<8x36xbf16>, vector<36x512xbf16>, vector<8x512xf32> -> vector<8x512xf32>
    %cst_3 = arith.constant dense<0.000000e+00> : vector<8xf32>
    %3 = vector.multi_reduction <add>, %2, %cst_3 [1] : vector<8x512xf32> to vector<8xf32>
    %4 = vector.shape_cast %3 : vector<8xf32> to vector<8x1xf32>
    %cst_4 = arith.constant 0.001953125 : f32
    %5 = vector.broadcast %cst_4 : f32 to vector<8x1xf32>
    %6 = arith.mulf %4, %5 : vector<8x1xf32>
    %7 = arith.mulf %2, %2 : vector<8x512xf32>
    %cst_5 = arith.constant dense<0.000000e+00> : vector<8xf32>
    %8 = vector.multi_reduction <add>, %7, %cst_5 [1] : vector<8x512xf32> to vector<8xf32>
    %9 = vector.shape_cast %8 : vector<8xf32> to vector<8x1xf32>
    %cst_6 = arith.constant 0.001953125 : f32
    %10 = vector.broadcast %cst_6 : f32 to vector<8x1xf32>
    %11 = arith.mulf %9, %10 : vector<8x1xf32>
    %12 = arith.mulf %6, %6 : vector<8x1xf32>
    %13 = arith.subf %11, %12 : vector<8x1xf32>
    %cst_7 = arith.constant 0.000000e+00 : f32
    %14 = vector.broadcast %cst_7 : f32 to vector<8x1xf32>
    %15 = arith.maximumf %13, %14 : vector<8x1xf32>
    %c0_8 = arith.constant 0 : index
    %c0_9 = arith.constant 0 : index
    %16 = vector.load %arg3[%c0_8, %c0_9] : memref<8x1xf32, #tpu.memory_space<vmem>>, vector<8x1xf32>
    %cst_10 = arith.constant 9.99999974E-6 : f32
    %17 = vector.broadcast %cst_10 : f32 to vector<8x1xf32>
    %18 = arith.addf %15, %17 : vector<8x1xf32>
    %19 = math.rsqrt %18 : vector<8x1xf32>
    %20 = arith.mulf %16, %19 : vector<8x1xf32>
    %c0_11 = arith.constant 0 : index
    %c0_12 = arith.constant 0 : index
    %21 = vector.load %arg4[%c0_11, %c0_12] : memref<8x1xf32, #tpu.memory_space<vmem>>, vector<8x1xf32>
    %22 = arith.mulf %6, %20 : vector<8x1xf32>
    %23 = arith.subf %21, %22 : vector<8x1xf32>
    %24 = vector.broadcast %20 : vector<8x1xf32> to vector<8x512xf32>
    %25 = arith.mulf %2, %24 : vector<8x512xf32>
    %26 = vector.broadcast %23 : vector<8x1xf32> to vector<8x512xf32>
    %27 = arith.addf %25, %26 : vector<8x512xf32>
    %cst_13 = arith.constant 0.000000e+00 : f32
    %28 = vector.broadcast %cst_13 : f32 to vector<8x512xf32>
    %29 = arith.maximumf %27, %28 : vector<8x512xf32>
    %c0_14 = arith.constant 0 : index
    %c0_15 = arith.constant 0 : index
    %30 = vector.load %arg5[%c0_14, %c0_15] : memref<8x512xf32, #tpu.memory_space<vmem>>, vector<8x512xf32>
    tpu.vector_store %arg5[%c0_14, %c0_15], %29 {strides = array<i32>} : memref<8x512xf32, #tpu.memory_space<vmem>>, vector<8x512xf32>,
    return
  }
  func.func @transform_0(%arg0: i32) -> (i32, i32) {
    %c0_i32 = arith.constant 0 : i32
    %c0_i32_0 = arith.constant 0 : i32
    %c0_i32_1 = arith.constant 0 : i32
    return %c0_i32, %c0_i32_0 : i32, i32
  }
  func.func @transform_1(%arg0: i32) -> (i32, i32) {
    %c0_i32 = arith.constant 0 : i32
    %c0_i32_0 = arith.constant 0 : i32
    %c0_i32_1 = arith.constant 0 : i32
    return %c0_i32, %c0_i32_0 : i32, i32
  }
  func.func @transform_2(%arg0: i32) -> (i32, i32) {
    %c0_i32 = arith.constant 0 : i32
    %c0_i32_0 = arith.constant 0 : i32
    %c0_i32_1 = arith.constant 0 : i32
    return %c0_i32, %c0_i32_0 : i32, i32
  }
  func.func @transform_3(%arg0: i32) -> (i32, i32) {
    %c0_i32 = arith.constant 0 : i32
    %c0_i32_0 = arith.constant 0 : i32
    %c0_i32_1 = arith.constant 0 : i32
    return %c0_i32, %c0_i32_0 : i32, i32
  }
  func.func @transform_4(%arg0: i32) -> (i32, i32) {
    %c0_i32 = arith.constant 0 : i32
    %c0_i32_0 = arith.constant 0 : i32
    %c0_i32_1 = arith.constant 0 : i32
    return %c0_i32, %c0_i32_0 : i32, i32
  }
}

</mosaic_0001>

<bundles_post_ra>
// kernel: conv_block_forward.1
= control target key start
LH: loop header
LB: loop body
LE: loop exit
PB: predicated region body
PF: predicated region fallthrough
CT: control target
= control target key end

     0   :  { %vm83_vm0 = vcmask 1041408   ;;  %vm79_vm1 = vcmask 293888   ;;  %v262_v57 = vmov 0   ;;  %s367_s0 = inlined_call_operand.vmem [shape: bf16[36,512], index: 0, kind: input, shape index: {}]   ;;  %s368_s1 = inlined_call_operand.vmem [shape: bf16[8,36], index: 1, kind: input, shape index: {}]   ;;  %s369_s2 = inlined_call_operand.vmem [shape: f32[8,1], index: 2, kind: input, shape index: {}]   ;;  %s370_s3 = inlined_call_operand.vmem [shape: f32[8,1], index: 3, kind: input, shape index: {}]   ;;  %s371_s4 = inlined_call_operand.vmem [shape: f32[8,512], index: 4, kind: output, shape index: {}]  }
   0x1   :  { %v27_v0 = vld [vmem:[%s367_s0 + $0x40] sm:$0x33]  ;;  %v28_v1 = vld [vmem:[%s367_s0 + $0x48] sm:$0x33]  ;;  %v255_v7 = vld [vmem:[%s367_s0 + $0x2c] sm:$0xf0]  ;;  %258 = vset.pattern.permute.xlu1 %v262_v57  ;;  %259 = vset.pattern.permute.xlu0 %v262_v57 }
   0x2   :  { %v55_v2 = vunpack.c.l.b16 %v27_v0  ;;  %v56_v3 = vunpack.c.h.b16 %v27_v0  ;;  %v57_v4 = vunpack.c.l.b16 %v28_v1  ;;  %v58_v5 = vunpack.c.h.b16 %v28_v1  ;;  %v231_v6 = vld [vmem:[%s367_s0 + $0x20] sm:$0xf]  ;;  %v253_v12 = vld [vmem:[%s367_s0 + $0x24] sm:$0xf]  ;;  %v233_v13 = vld [vmem:[%s367_s0 + $0x30] sm:$0xf0] }
   0x3   :  { %v239_v14 = vld [vmem:[%s367_s0 + $0x28] sm:$0xf]  ;;  %v256_v15 = vld [vmem:[%s367_s0 + $0x34] sm:$0xf0]  ;;  %v254_v16 = vld [vmem:[%s367_s0 + $0x2c] sm:$0xf]  ;;  %v232_v22 = vor.u32 %v255_v7, %v231_v6  ;;  %v236_v23 = vor.u32 %v253_v12, %v233_v13 }
   0x4   :  { %v67_v8 = vpack.c.b16 %v55_v2, %v55_v2  ;;  %v68_v9 = vpack.c.b16 %v56_v3, %v56_v3  ;;  %v69_v10 = vpack.c.b16 %v57_v4, %v57_v4  ;;  %v70_v11 = vpack.c.b16 %v58_v5, %v58_v5  ;;  %v241_v17 = vld [vmem:[%s367_s0 + $0x38] sm:$0xf0]  ;;  %v215_v24 = vld [vmem:[%s367_s0] sm:$0xf]  ;;  %v251_v25 = vld [vmem:[%s367_s0 + $0xc] sm:$0xf0] }
   0x5   :  { %v240_v26 = vor.u32 %v256_v15, %v239_v14  ;;  %v244_v27 = vor.u32 %v254_v16, %v241_v17  ;;  %v249_v28 = vld [vmem:[%s367_s0 + $0x4] sm:$0xf]  ;;  %v217_v29 = vld [vmem:[%s367_s0 + $0x10] sm:$0xf0]  ;;  %v223_v30 = vld [vmem:[%s367_s0 + $0x8] sm:$0xf]  ;;  %v216_v34 = vor.u32 %v251_v25, %v215_v24 }
   0x6   :  { %v85_v18 = vsel %vm83_vm0, %v67_v8, 0  ;;  %v88_v19 = vsel %vm83_vm0, %v68_v9, 0  ;;  %v91_v20 = vsel %vm83_vm0, %v69_v10, 0  ;;  %v94_v21 = vsel %vm83_vm0, %v70_v11, 0  ;;  %v252_v31 = vld [vmem:[%s367_s0 + $0x14] sm:$0xf0] }
   0x7   :  { %101 = vmatpush.bf16.msra.mxu0 %v85_v18  ;;  %114 = vmatpush.bf16.msra.mxu1 %v88_v19  ;;  %v250_v32 = vld [vmem:[%s367_s0 + $0xc] sm:$0xf]  ;;  %v225_v33 = vld [vmem:[%s367_s0 + $0x18] sm:$0xf0]  ;;  %v220_v35 = vor.u32 %v249_v28, %v217_v29  ;;  %v224_v36 = vor.u32 %v252_v31, %v223_v30  ;;  %v18_v38 = vld [vmem:[%s368_s1] sm:$0xf] }
   0x8   :  { %127 = vmatpush.bf16.msra.mxu2 %v91_v20  ;;  %140 = vmatpush.bf16.msra.mxu3 %v94_v21  ;;  %v228_v37 = vor.u32 %v250_v32, %v225_v33  ;;  %v167_v7 = vld [vmem:[%s369_s2] sm:$0xff] }
   0x9   :  { %v180_v12 = vld [vmem:[%s370_s3] sm:$0xff] }
   0xb   :  { %102 = vmatpush.bf16.msra.mxu0 %v232_v22  ;;  %115 = vmatpush.bf16.msra.mxu1 %v236_v23 }
   0xc   :  { %128 = vmatpush.bf16.msra.mxu2 %v240_v26  ;;  %141 = vmatpush.bf16.msra.mxu3 %v244_v27 }
   0xf   :  { %103 = vmatpush.bf16.msra.mxu0 %v216_v34  ;;  %116 = vmatpush.bf16.msra.mxu1 %v220_v35 }
  0x10   :  { %129 = vmatpush.bf16.msra.mxu2 %v224_v36  ;;  %142 = vmatpush.bf16.msra.mxu3 %v228_v37 }
  0x12   :  { %245 = vmatmul.msk.bf16.vlgmr.msra.gmra.mxu0 %vm79_vm1, %v18_v38  ;;  %246 = vmatmul.msk.bf16.vlgmr.msra.gmra.mxu1 %vm79_vm1, %v18_v38 }
  0x13   :  { %247 = vmatmul.msk.bf16.vlgmr.msra.gmra.mxu2 %vm79_vm1, %v18_v38  ;;  %248 = vmatmul.msk.bf16.vlgmr.msra.gmra.mxu3 %vm79_vm1, %v18_v38 }
  0x8f   :  { %v105_v39 = vpop.f32.mrf.mxu0  ;;  %v118_v40 = vpop.f32.mrf.mxu1 }
  0x90   :  { %v148_v41 = vadd.f32 %v118_v40, %v105_v39  ;;  %v154_v42 = vmul.f32 %v105_v39, %v105_v39  ;;  %v155_v43 = vmul.f32 %v118_v40, %v118_v40 }
  0x92   :  { %v158_v51 = vadd.f32 %v155_v43, %v154_v42 }
  0x96   :  { %v131_v44 = vpop.f32.mrf.mxu2  ;;  %v144_v45 = vpop.f32.mrf.mxu3 }
  0x97   :  { %v107_v46 = vpop.f32.mrf.mxu0  ;;  %v120_v47 = vpop.f32.mrf.mxu1  ;;  %v149_v48 = vadd.f32 %v148_v41, %v131_v44  ;;  %v156_v49 = vmul.f32 %v131_v44, %v131_v44  ;;  %v157_v52 = vmul.f32 %v144_v45, %v144_v45 }
  0x99   :  { %v150_v50 = vadd.f32 %v149_v48, %v144_v45  ;;  %v159_v53 = vadd.f32 %v158_v51, %v156_v49 }
  0x9b   :  { %151 = vadd.xlane.f32.xlu0 %v150_v50  ;;  %v160_v56 = vadd.f32 %v159_v53, %v157_v52 }
  0x9e   :  { %v133_v54 = vpop.f32.mrf.mxu2  ;;  %v146_v55 = vpop.f32.mrf.mxu3 }
  0xa3   :  { %161 = vadd.xlane.f32.xlu0 %v160_v56 }
 0x10e   :  { %v152_v58 = vpop.xlane.xlu0 %151 }
 0x10f   :  { %v153_v59 = vmul.f32 0.001953125, %v152_v58 }
 0x111   :  { %v164_v61 = vmul.f32 %v153_v59, %v153_v59 }
 0x116   :  { %v162_v60 = vpop.xlane.xlu0 %161 }
 0x117   :  { %v163_v62 = vmul.f32 0.001953125, %v162_v60 }
 0x119   :  { %v165_v63 = vsub.f32 %v163_v62, %v164_v61 }
 0x11b   :  { %v166_v0 = vmax.f32 %v165_v63, 0.0 }
 0x11d   :  { %v168_v1 = vadd.f32 1e-05, %v166_v0 }
 0x11f   :  { %260 = vrsqrt.f32 %v168_v1  ;;  %vm175_vm3 = vweird.f32 %v168_v1 }
 0x125   :  { %v261_v2 = vpop.eup %260 }
 0x126   :  { %v170_v3 = vmul.f32 %v261_v2, %v168_v1  ;;  %vm176_vm2 = vweird.f32 %v261_v2 }
 0x127   :  { %vm177_vm4 = vmor %vm175_vm3, %vm176_vm2 }
 0x128   :  { %v171_v4 = vmul.f32 %v261_v2, %v170_v3 }
 0x12a   :  { %v172_v5 = vmul.f32 0.5, %v171_v4 }
 0x12c   :  { %v173_v6 = vsub.f32 1.5, %v172_v5 }
 0x12e   :  { %v174_v8 = vmul.f32 %v261_v2, %v173_v6 }
 0x130   :  { %v178_v9 = vsel %vm177_vm4, %v261_v2, %v174_v8 }
 0x131   :  { %v179_v10 = vmul.f32 %v178_v9, %v167_v7 }
 0x133   :  { %185 = vperm.xlu1 %258, %v179_v10   ;;  %v181_v11 = vmul.f32 %v179_v10, %v153_v59 }
 0x135   :  { %v182_v13 = vsub.f32 %v180_v12, %v181_v11 }
 0x13b   :  { %194 = vperm.xlu1 %258, %v182_v13  }
 0x1a5   :  { %v186_v14 = vpop.permute.xlu1 %185 }
 0x1a6   :  { %v188_v15 = vmul.f32 %v186_v14, %v105_v39  ;;  %v189_v16 = vmul.f32 %v186_v14, %v118_v40  ;;  %v190_v17 = vmul.f32 %v186_v14, %v131_v44  ;;  %v191_v18 = vmul.f32 %v186_v14, %v144_v45 }
 0x1ad   :  { %v195_v19 = vpop.permute.xlu1 %194 }
 0x1ae   :  { %v197_v20 = vadd.f32 %v195_v19, %v188_v15  ;;  %v198_v21 = vadd.f32 %v195_v19, %v189_v16  ;;  %v199_v22 = vadd.f32 %v195_v19, %v190_v17  ;;  %v200_v23 = vadd.f32 %v195_v19, %v191_v18 }
 0x1b0   :  { %v201_v24 = vmax.f32 %v197_v20, 0.0  ;;  %v202_v25 = vmax.f32 %v198_v21, 0.0  ;;  %v203_v26 = vmax.f32 %v199_v22, 0.0  ;;  %v204_v27 = vmax.f32 %v200_v23, 0.0 }
 0x1b2   :  { %205 = vst [vmem:[%s371_s4] sm:$0xff] %v201_v24 }
 0x1b3   :  { %206 = vst [vmem:[%s371_s4 + $0x8] sm:$0xff] %v202_v25 }
 0x1b4   :  { %207 = vst [vmem:[%s371_s4 + $0x10] sm:$0xff] %v203_v26 }
 0x1b5   :  { %208 = vst [vmem:[%s371_s4 + $0x18] sm:$0xff] %v204_v27 }

</bundles_post_ra>
